<compile_context>
chip_gen: v7x
topology: tpu7x:2x2x1
jax: 0.10.0
libtpu: 0.0.40
codegen_flags: <defaults>
</compile_context>

<pallas_src>
import numpy as np
import jax
import jax.numpy as jnp
from jax.experimental import pallas as pl
from jax.experimental.pallas import tpu as pltpu


def build_grid(resolution):
    ranges = [np.linspace(0.0, 1.0, num=res) for res in resolution]
    grid = np.meshgrid(*ranges, sparse=False, indexing="ij")
    grid = np.stack(grid, axis=-1)
    grid = np.reshape(grid, [resolution[0], resolution[1], -1])
    grid = np.expand_dims(grid, axis=0)
    grid = grid.astype(np.float32)
    return np.concatenate([grid, 1.0 - grid], axis=-1)  # (1, H, W, 4)


def _add_kernel(x_ref, emb_ref, o_ref):
    # Pure VPU broadcast-add: (1, rows_blk, L) + (rows_blk, L).
    # Accumulate in f32, cast back to the output dtype (exact no-op for f32).
    o_ref[...] = (x_ref[...].astype(jnp.float32) + emb_ref[...]).astype(o_ref.dtype)


def _pick_layout(n_flat, elem_bytes, budget_bytes=2 * 1024 * 1024):
    """Pick a lane-dense flat layout (rows, lanes, rows_per_block) for n_flat elems.

    Prefers the widest lane count that still leaves >= 8 sublane rows (full
    vreg occupancy). Returns None if n_flat is not a multiple of 128; the
    caller then falls back to the (H*W, hidden) layout, which is still correct,
    just not guaranteed lane-dense.
    """
    candidates = [c for c in (1024, 512, 256, 128) if n_flat % c == 0]
    if not candidates:
        return None
    lanes = None
    for cand in candidates:                    # widest first, want rows >= 8
        if n_flat // cand >= 8:
            lanes = cand
            break
    if lanes is None:
        lanes = candidates[0]
    rows = n_flat // lanes

    # Cap per-block bytes so double-buffered x/out plus the resident emb block
    # stay far below the default scoped VMEM (32 MiB on v6e/v7x, 16 MiB v5e).
    max_rows = max(8, budget_bytes // (lanes * max(elem_bytes, 1)))
    rows_blk = rows
    if rows > max_rows:
        d = (max_rows // 8) * 8                # keep sublane dim a multiple of 8
        while d >= 8:
            if rows % d == 0:
                rows_blk = d
                break
            d -= 8
    return rows, lanes, rows_blk


def soft_position_embed(inputs, weight, bias):
    """inputs: (B, hidden, H, W) NCHW — same layout as the PyTorch module."""
    B, C, H, W = inputs.shape
    P = H * W
    N = P * C

    # Batch-invariant embedding: nn.Linear(4, hidden)(grid) -> (P, hidden),
    # flattened in the exact raw (h, w, c) order PyTorch's `.view` reinterprets.
    # This 4-wide matmul is negligible, so it is done once here (XLA), and the
    # Pallas kernel handles the memory-bound broadcast-add.
    grid_flat = jnp.asarray(build_grid((H, W)).reshape(P, 4))               # (P, 4) f32
    emb_flat = (grid_flat @ weight.astype(jnp.float32).T
                + bias.astype(jnp.float32)).reshape(N)                       # (N,) f32

    layout = _pick_layout(N, jnp.dtype(inputs.dtype).itemsize)
    if layout is not None:
        R, L, rows_blk = layout
    else:
        # Fallback when H*W*hidden % 128 != 0: lane dim = hidden (padded lanes),
        # block = full array extent -> still correct, just not lane-dense.
        R, L, rows_blk = P, C, P

    # Give the parallel grid >= 2 blocks so both v7x TensorCores get work.
    if B * (R // rows_blk) < 2 and rows_blk % 16 == 0:
        rows_blk //= 2
    n_row_blocks = R // rows_blk

    x3d = inputs.reshape(B, R, L)        # raw flat reinterpretation of NCHW (view)
    emb2d = emb_flat.reshape(R, L)

    out = pl.pallas_call(
        _add_kernel,
        out_shape=jax.ShapeDtypeStruct((B, R, L), inputs.dtype),
        grid_spec=pltpu.PrefetchScalarGridSpec(
            num_scalar_prefetch=0,
            # Batch innermost: the emb block index depends only on r, so it stays
            # resident in VMEM and only R*L*4 bytes of emb are DMA'd in total.
            grid=(n_row_blocks, B),
            in_specs=[
                pl.BlockSpec((1, rows_blk, L), lambda r, b: (b, r, 0)),   # x
                pl.BlockSpec((rows_blk, L), lambda r, b: (r, 0)),         # emb (batch-invariant)
            ],
            out_specs=pl.BlockSpec((1, rows_blk, L), lambda r, b: (b, r, 0)),
        ),
        compiler_params=pltpu.CompilerParams(
            dimension_semantics=("parallel", "parallel")),
        # Reuse the input HBM buffer for the output.
        input_output_aliases={0: 0},
    )(x3d, emb2d)

    return out.reshape(B, C, H, W)


if __name__ == "__main__":
    B, hidden, res = 2, 32, 16  # inputs (B, hidden, H, W), H = W = resolution

    key = jax.random.PRNGKey(0)
    k_x, k_w, k_b = jax.random.split(key, 3)

    inputs = jax.random.normal(k_x, (B, hidden, res, res), dtype=jnp.float32)

    # Deterministic nn.Linear(4, hidden) init (uniform +/- 1/sqrt(in_features)).
    bound = 1.0 / np.sqrt(4.0)
    weight = jax.random.uniform(k_w, (hidden, 4), minval=-bound, maxval=bound,
                                dtype=jnp.float32)
    bias = jax.random.uniform(k_b, (hidden,), minval=-bound, maxval=bound,
                              dtype=jnp.float32)

    out = jax.block_until_ready(soft_position_embed(inputs, weight, bias))

    # Pure-JAX reference of the exact PyTorch semantics.
    grid = jnp.asarray(build_grid((res, res)))                     # (1, H, W, 4)
    emb = jnp.einsum("bhwk,ck->bhwc", grid, weight) + bias         # (1, H, W, hidden)
    emb_viewed = emb.reshape(-1, hidden, res, res)                 # raw .view
    ref = inputs + emb_viewed

    assert out.shape == (B, hidden, res, res)
    assert out.dtype == jnp.float32
    np.testing.assert_allclose(np.asarray(out), np.asarray(ref), rtol=1e-5, atol=1e-5)
    print("KERNEL_OK")
</pallas_src>

<mosaic_0001>
module attributes {stable_mosaic.version = 11 : i64} {
  func.func @_add_kernel(%arg0: i32, %arg1: i32, %arg2: memref<1x8x1024xf32, #tpu.memory_space<vmem>>, %arg3: memref<8x1024xf32, #tpu.memory_space<vmem>>, %arg4: memref<1x8x1024xf32, #tpu.memory_space<vmem>>) attributes {dimension_semantics = [#tpu.dimension_semantics<parallel>, #tpu.dimension_semantics<parallel>], iteration_bounds = array<i64: 1, 2>, scalar_prefetch = 0 : i64, scratch_operands = 0 : i64, tpu.core_type = #tpu.core_type<tc>, window_params = [{transform_indices = @transform_0, window_bounds = array<i64: 1, 8, 1024>}, {transform_indices = @transform_1, window_bounds = array<i64: 8, 1024>}, {transform_indices = @transform_2, window_bounds = array<i64: 1, 8, 1024>}]} {
    %c0 = arith.constant 0 : index
    %c0_0 = arith.constant 0 : index
    %c0_1 = arith.constant 0 : index
    %0 = vector.load %arg2[%c0, %c0_0, %c0_1] : memref<1x8x1024xf32, #tpu.memory_space<vmem>>, vector<1x8x1024xf32>
    %c0_2 = arith.constant 0 : index
    %c0_3 = arith.constant 0 : index
    %1 = vector.load %arg3[%c0_2, %c0_3] : memref<8x1024xf32, #tpu.memory_space<vmem>>, vector<8x1024xf32>
    %2 = vector.shape_cast %1 : vector<8x1024xf32> to vector<1x8x1024xf32>
    %3 = arith.addf %0, %2 : vector<1x8x1024xf32>
    %c0_4 = arith.constant 0 : index
    %c0_5 = arith.constant 0 : index
    %c0_6 = arith.constant 0 : index
    %4 = vector.load %arg4[%c0_4, %c0_5, %c0_6] : memref<1x8x1024xf32, #tpu.memory_space<vmem>>, vector<1x8x1024xf32>
    tpu.vector_store %arg4[%c0_4, %c0_5, %c0_6], %3 {strides = array<i32>} : memref<1x8x1024xf32, #tpu.memory_space<vmem>>, vector<1x8x1024xf32>,
    return
  }
  func.func @transform_0(%arg0: i32, %arg1: i32) -> (i32, i32, i32) {
    %c0_i32 = arith.constant 0 : i32
    %c0_i32_0 = arith.constant 0 : i32
    return %arg1, %arg0, %c0_i32 : i32, i32, i32
  }
  func.func @transform_1(%arg0: i32, %arg1: i32) -> (i32, i32) {
    %c0_i32 = arith.constant 0 : i32
    %c0_i32_0 = arith.constant 0 : i32
    return %arg0, %c0_i32 : i32, i32
  }
  func.func @transform_2(%arg0: i32, %arg1: i32) -> (i32, i32, i32) {
    %c0_i32 = arith.constant 0 : i32
    %c0_i32_0 = arith.constant 0 : i32
    return %arg1, %arg0, %c0_i32 : i32, i32, i32
  }
}

</mosaic_0001>

<bundles_post_ra>
// kernel: tpu_custom_call.1
= control target key start
LH: loop header
LB: loop body
LE: loop exit
PB: predicated region body
PF: predicated region fallthrough
CT: control target
= control target key end

     0   :  { %7 = vsyncpa [#allocation3], 0  ;;  %s753_s0 = inlined_call_operand.hbm [shape: f32[2,8,1024], index: 0, kind: input, shape index: {}, may-alias: {0,2}]   ;;  %s754_s1 = inlined_call_operand.vmem [shape: f32[8,1024], index: 1, kind: input, shape index: {}]   ;;  %s755_s2 = inlined_call_operand.hbm [shape: f32[2,8,1024], index: 2, kind: output, shape index: {}, may-alias: {0,2}]  }
   0x1   :  { %9 = vsyncpa [#allocation3 + $0x1], 0 }
   0x2   :  { %10 = vsyncpa [#allocation4], 0 }
   0x3   :  { %12 = vsyncpa [#allocation4 + $0x1], 0  ;;  %s557_s9 = smov 0   ;;  %s559_s10 = smov 0  }
   0x4   :  { %s561_s11 = smov 0   ;;  %s563_s12 = smov 0  }
   0x5   :  { %s565_s13 = smov 0   ;;  %s567_s14 = smov 0  }
   0x6 LB: > { %s346_s15 = sadd.s32 4294967295, %s538_s14   ;;  %s347_s16 = sadd.s32 4294967294, %s538_s14   ;;  %s538_s14 = sphi %s567_s14, %s18_s14   ;;  %s534_s13 = sphi %s565_s13, %s771_s13   ;;  %s530_s12 = sphi %s563_s12, %s770_s12   ;;  %s526_s11 = sphi %s561_s11, %s769_s11   ;;  %s522_s10 = sphi %s559_s10, %s768_s10   ;;  %s518_s9 = sphi %s557_s9, %s767_s9  }
   0x7   : > { %s27_s17 = sadd.s32 1, %s534_s13  ;;  %s39_s18 = sadd.s32 1, %s526_s11 }
   0x8   : > { %p28_p0 = scmp.ge.s32.totalorder %s27_s17, 2  ;;  %p46_p1 = scmp.ne.s32.totalorder %s526_s11, %s522_s10 }
   0x9   : > { %p47_p2 = scmp.eq.s32.totalorder %s538_s14, 0  ;;  %p52_p3 = scmp.ne.s32.totalorder %s522_s10, %s518_s9 }
   0xa   : > { %s773_s17 = smov (%p28_p0, %s27_s17), 0  ;;  %p53_p5 = scmp.eq.s32.totalorder %s346_s15, 0 }
   0xb   : > { %p598_p4 = por %p47_p2, %p46_p1  ;;  %s34_s20 = ssub.s32 %s534_s13, %s773_s17 }
   0xc   : > { %p104_p6 = scmp.eq.s32.totalorder %s346_s15, 1  ;;  %p37_p7 = scmp.eq.s32.totalorder %s34_s20, 0 }
   0xd   : > { %p604_p8 = por %p53_p5, %p52_p3  ;;  %p110_p10 = scmp.eq.s32.totalorder %s347_s16, 1 }
   0xe   : > { %p608_p9 = por %p104_p6, %p46_p1  ;;  %p376_p13 = scmp.lt.s32.totalorder %s538_s14, 2 }
   0xf   : > { %s613_s23 = scalar_select %p37_p7, %s526_s11, %s39_s18  }
  0x10   : > { %s759_s22 = scalar_select %p608_p9, 1, 0 }
  0x11   : > { %p615_p11 = por %p110_p10, %p52_p3  ;;  %s138_s25 = sand.u32 1, %s526_s11  }
  0x12   : > { %s351_s26 = sshll.u32 %s138_s25, 6  ;;  %s362_s27 = sshll.u32 %s534_s13, 10 }
  0x13   : > { %s760_s24 = scalar_select %p615_p11, 1, 0 }
  0x14   : > { %s626_s30 = scalar_lea.hbm %s753_s0, %s362_s27  ;;  %s142_s3 = scalar_lea.vmem [#allocation2], %s351_s26 }
  0x15   : > { %s152_s4 = sshll.u32 %s142_s3, 4  ;;  %p632_p0 = pnand %p376_p13, %p598_p4  ;;  %s628_s4 = int_to_ptr.vmem [resolvable:$true] %s152_s4 }
  0x16   : > { %s139_s6 = scalar_lea.sflag [#allocation3], %s138_s25  ;;  %s426_s7 = scalar_lea.hbm %s626_s30, 1024 }
  0x17   : > { %p427_p3 = scmp.ne.s32.totalorder %s626_s30, %s426_s7  ;;  %p428_p5 = pneg %p632_p0 }
  0x18   : > { %s431_s16 = scalar_lea.hbm %s753_s0, 2048  ;;  %p432_p4 = scmp.lt.u32.totalorder %s626_s30, %s753_s0 }
  0x19   : > { %p429_p6 = pnand %p428_p5, %p427_p3  ;;  %p433_p10 = scmp.lt.u32.totalorder %s431_s16, %s426_s7 }
  0x1a   : > { %p435_p12 = scmp.lt.u32.totalorder %s426_s7, %s626_s30 }
  0x1b   : > { %p430_p7 = pneg %p429_p6  ;;  %p434_p13 = por %p433_p10, %p432_p4 }
  0x1d   : > { %p436_p1 = por %p435_p12, %p434_p13 }
  0x1f   : > { %p437_p2 = pnand %p436_p1, %p430_p7 }
  0x21   : > { %440 = shalt.err (!%p437_p2)
}
  0x22   : > { %s441_s20 = scalar_lea.vmem %s628_s4, 1024  ;;  %s540_s25 = smov [#allocation2]  }
  0x23   : > { %p442_p3 = scmp.ne.s32.totalorder %s628_s4, %s441_s20  ;;  %s446_s26 = sshll.u32 %s540_s25, 4  ;;  %s447_s26 = int_to_ptr.vmem [resolvable:$false] %s446_s26 }
  0x24   : > { %s448_s27 = scalar_lea.vmem %s447_s26, 2048  ;;  %p449_p9 = scmp.lt.s32.totalorder %s628_s4, %s447_s26 }
  0x25   : > { %p444_p6 = pnand %p442_p3, %p428_p5  ;;  %p450_p4 = scmp.lt.s32.totalorder %s448_s27, %s441_s20 }
  0x27   : > { %p445_p11 = pneg %p444_p6  ;;  %p451_p10 = por %p450_p4, %p449_p9 }
  0x29   : > { %p452_p12 = pnand %p451_p10, %p445_p11 }
  0x2b   : > { %455 = shalt.err (!%p452_p12)
}
  0x2c   : > { %371 = dma.hbm_to_vmem [thread:$0]  (!%p632_p0), %s626_s30, 1024, %s628_s4, %s139_s6  }
  0x2d   : > { %p762_p1 = scmp.lt.s32.totalorder %s538_s14, 3  ;;  %p763_p2 = scmp.ge.s32.totalorder %s538_s14, 1 }
  0x2f   : > { %p158_p5 = pnand %p763_p2, %p762_p1 }
  0x30   : > { %s668_s28 = sand.u32 (!%p158_p5), 1, %s522_s10  }
  0x31   : > { %161 = sbr.rel (%p158_p5) target bundleno = 83 (0x53), region = 28  ;;  %s355_s29 = sshll.u32 (!%p158_p5), %s668_s28, 6 }
  0x32   : > { %s164_s3 = scalar_lea.sflag (!%p158_p5), [#allocation3], %s668_s28  ;;  %s167_s7 = scalar_lea.vmem (!%p158_p5), [#allocation2], %s355_s29 }
  0x38   : > { %509 = dma.done.wait (%p604_p8), %s164_s3, 1024  }
  0x39   : > { %511 = vsyncadd (%p604_p8), %s164_s3, 4294966272  ;;  %v198_v0 = vld [vmem:[%s167_s7] sm:$0xff]  ;;  %v199_v2 = vld [vmem:[%s167_s7 + $0x8] sm:$0xff]  ;;  %s192_s18 = scalar_lea.vmem [#allocation5], %s355_s29  ;;  %s363_s27 = sshll.u32 %s530_s12, 10 }
  0x3a   : > { %v206_v1 = vld [vmem:[%s754_s1] sm:$0xff]  ;;  %v207_v4 = vld [vmem:[%s754_s1 + $0x8] sm:$0xff]  ;;  %v200_v5 = vld [vmem:[%s167_s7 + $0x10] sm:$0xff]  ;;  %s247_s3 = sshll.u32 %s192_s18, 4  ;;  %s704_s8 = scalar_lea.hbm %s755_s2, %s363_s27  ;;  %s706_s3 = int_to_ptr.vmem [resolvable:$true] %s247_s3 }
  0x3b   : > { %v214_v3 = vadd.f32 %v206_v1, %v198_v0  ;;  %v208_v6 = vld [vmem:[%s754_s1 + $0x10] sm:$0xff]  ;;  %v215_v7 = vadd.f32 %v207_v4, %v199_v2  ;;  %v201_v9 = vld [vmem:[%s167_s7 + $0x18] sm:$0xff]  ;;  %v202_v11 = vld [vmem:[%s167_s7 + $0x20] sm:$0xff]  ;;  %s456_s15 = scalar_lea.vmem %s706_s3, 1024  ;;  %p764_p9 = scmp.ne.s32.totalorder %s759_s22, 0 }
  0x3c   : > { %v216_v8 = vadd.f32 %v208_v6, %v200_v5  ;;  %v209_v10 = vld [vmem:[%s754_s1 + $0x18] sm:$0xff]  ;;  %v210_v13 = vld [vmem:[%s754_s1 + $0x20] sm:$0xff]  ;;  %v203_v14 = vld [vmem:[%s167_s7 + $0x28] sm:$0xff]  ;;  %p457_p8 = scmp.ne.s32.totalorder %s706_s3, %s456_s15  ;;  %s541_s21 = smov [#allocation5]  }
  0x3d   : > { %222 = vst [vmem:[%s192_s18] sm:$0xff] %v214_v3  ;;  %v217_v12 = vadd.f32 %v209_v10, %v201_v9  ;;  %v211_v15 = vld [vmem:[%s754_s1 + $0x28] sm:$0xff]  ;;  %223 = vst [vmem:[%s192_s18 + $0x8] sm:$0xff] %v215_v7  ;;  %v218_v16 = vadd.f32 %v210_v13, %v202_v11  ;;  %v204_v18 = vld [vmem:[%s167_s7 + $0x30] sm:$0xff]  ;;  %s460_s16 = sshll.u32 %s541_s21, 4  ;;  %s461_s16 = int_to_ptr.vmem [resolvable:$false] %s460_s16 }
  0x3e   : > { %224 = vst [vmem:[%s192_s18 + $0x10] sm:$0xff] %v216_v8  ;;  %v219_v17 = vadd.f32 %v211_v15, %v203_v14  ;;  %v212_v19 = vld [vmem:[%s754_s1 + $0x30] sm:$0xff]  ;;  %v205_v20 = vld [vmem:[%s167_s7 + $0x38] sm:$0xff]  ;;  %s231_s7 = scalar_lea.sflag [#allocation4], %s668_s28  ;;  %p458_p11 = pnand %p457_p8, %p764_p9 }
  0x3f   : > { %225 = vst [vmem:[%s192_s18 + $0x18] sm:$0xff] %v217_v12  ;;  %v220_v21 = vadd.f32 %v212_v19, %v204_v18  ;;  %v213_v22 = vld [vmem:[%s754_s1 + $0x38] sm:$0xff]  ;;  %226 = vst [vmem:[%s192_s18 + $0x20] sm:$0xff] %v218_v16  ;;  %s462_s19 = scalar_lea.vmem %s461_s16, 2048  ;;  %p463_p7 = scmp.lt.s32.totalorder %s706_s3, %s461_s16 }
  0x40   : > { %227 = vst [vmem:[%s192_s18 + $0x28] sm:$0xff] %v219_v17  ;;  %v221_v23 = vadd.f32 %v213_v22, %v205_v20  ;;  %p459_p0 = pneg %p458_p11  ;;  %p464_p13 = scmp.lt.s32.totalorder %s462_s19, %s456_s15 }
  0x41   : > { %228 = vst [vmem:[%s192_s18 + $0x30] sm:$0xff] %v220_v21 }
  0x42   : > { %229 = vst [vmem:[%s192_s18 + $0x38] sm:$0xff] %v221_v23  ;;  %p465_p3 = por %p464_p13, %p463_p7 }
  0x44   : > { %p466_p6 = pnand %p465_p3, %p459_p0 }
  0x46   : > { %469 = shalt.err (!%p466_p6)
}
  0x47   : > { %s470_s28 = scalar_lea.hbm %s704_s8, 1024  ;;  %s474_s25 = scalar_lea.hbm %s755_s2, 2048 }
  0x48   : > { %p471_p4 = scmp.ne.s32.totalorder %s704_s8, %s470_s28  ;;  %p475_p1 = scmp.lt.u32.totalorder %s704_s8, %s755_s2 }
  0x49   : > { %p476_p2 = scmp.lt.u32.totalorder %s474_s25, %s470_s28  ;;  %p478_p8 = scmp.lt.u32.totalorder %s470_s28, %s704_s8 }
  0x4a   : > { %p472_p10 = pnand %p471_p4, %p764_p9 }
  0x4b   : > { %p477_p5 = por %p476_p2, %p475_p1 }
  0x4c   : > { %p473_p12 = pneg %p472_p10 }
  0x4d   : > { %p479_p11 = por %p478_p8, %p477_p5 }
  0x4f   : > { %p480_p0 = pnand %p479_p11, %p473_p12 }
  0x51   : > { %483 = shalt.err (!%p480_p0)
}
  0x52   : > { %366 = dma.vmem_to_hbm [thread:$0]  (%p764_p9), %s706_s3, 1024, %s704_s8, %s231_s7  }
  0x53 PF: > { %s259_s29 = sand.u32 1, %s518_s9   ;;  %p765_p7 = scmp.ne.s32.totalorder %s760_s24, 0 }
  0x54   : > { %p766_p13 = scmp.ge.s32.totalorder %s538_s14, 2  ;;  %s260_s30 = scalar_lea.sflag [#allocation4], %s259_s29 }
  0x56   : > { %p373_p3 = pnand %p766_p13, %p765_p7 }
  0x58   : > { %513 = dma.done.wait (!%p373_p3), %s260_s30, 1024  }
  0x59   : > { %515 = vsyncadd (!%p373_p3), %s260_s30, 4294966272  ;;  %s18_s14 = sadd.s32 1, %s538_s14   ;;  %s767_s9 = smov %s522_s10 }
  0x5a   : > { %p15_p6 = scmp.ge.s32.totalorder %s18_s14, 4   ;;  %s768_s10 = smov %s526_s11 }
  0x5b   : > { %s769_s11 = smov %s613_s23  ;;  %s770_s12 = smov %s534_s13 }
  0x5c   : > { %s771_s13 = smov %s773_s17  ;;  %17 = sbr.rel (!%p15_p6) target bundleno = 6 (0x6), region = 76 }
  0x63   :  { %265 = vsyncpa [#allocation3], 1 }
  0x64   :  { %267 = vsyncpa [#allocation3 + $0x1], 1 }
  0x65   :  { %268 = vsyncpa [#allocation4], 1 }
  0x66   :  { %270 = vsyncpa [#allocation4 + $0x1], 1 }

</bundles_post_ra>
